<compile_context>
chip_gen: v7x
topology: tpu7x:2x2x1
jax: 0.10.0
libtpu: 0.0.40
codegen_flags: <defaults>
</compile_context>

<pallas_src>
import jax
import jax.numpy as jnp
from jax.experimental import pallas as pl
from jax.experimental.pallas import tpu as pltpu


def mix_kernel(idx_ref, inv_amp_ref, y_ref, bg_ref, o_ref):
    # idx_ref    : SMEM int32 (B,)   -- background source indices (consumed by index_map)
    # inv_amp_ref: SMEM f32   (B,)   -- 10**(-db/20) per batch element
    # y_ref      : VMEM (1, S*C, T)  -- mixture block for batch b (S packed into sublanes)
    # bg_ref     : VMEM (1, 1, C, T) -- y[idx[b], 1] gathered via data-dependent index_map
    # o_ref      : VMEM (1, S*C, T)
    b = pl.program_id(0)
    inv_amp = inv_amp_ref[b]

    y = y_ref[0].astype(jnp.float32)        # (S*C, T)  -- squares/means in f32 (bf16-safe)
    bg = bg_ref[0, 0].astype(jnp.float32)   # (C, T)
    sc = y.shape[0]
    c = bg.shape[0]
    s = sc // c                             # static broadcast factor (== 2 in the module)

    # --- tiny per-row factors: the only divide happens at (C, 1) width ---------------
    rms_bg = jnp.sqrt(jnp.mean(bg * bg, axis=-1, keepdims=True))        # (C, 1)
    inv_rms_bg = 1.0 / (rms_bg + 1e-8)                                  # exact (tolerance)
    rms_y = jnp.sqrt(jnp.mean(y * y, axis=-1, keepdims=True))           # (S*C, 1)
    inv_rms_rep = jnp.concatenate([inv_rms_bg] * s, axis=0)             # (S*C, 1)
    factor = rms_y * inv_amp * inv_rms_rep                              # (S*C, 1)

    # --- full-width work: one multiply + one add --------------------------------------
    # Replicating bg across S in sublanes reproduces repeat_interleave(2, dim=1).
    bg_rep = jnp.concatenate([bg] * s, axis=0)                          # (S*C, T)
    o_ref[0] = (y + bg_rep * factor).astype(o_ref.dtype)


def mix_forward(y, indices_background, db_scales, *, apply_mix=True):
    """Pallas equivalent of Mix.forward.  apply_mix=False is the identity / eval path."""
    if not apply_mix:
        return y

    B, S, C, T = y.shape
    idx = indices_background.astype(jnp.int32).reshape(B)                       # (B,)
    inv_amp = (10.0 ** (-db_scales.reshape(B).astype(jnp.float32) / 20.0))      # (B,) = 1/db2amp

    y_r = y.reshape(B, S * C, T)    # contiguous reshape: zero-cost, lane/sublane aligned

    # Explicit VMEM budget: double-buffered (y block + out block + bg block) + slack,
    # capped so the same config still fits v7x's 64 MiB physical VMEM.
    blk_bytes = (2 * S * C * T + C * T) * y.dtype.itemsize
    vmem_limit = int(min(max(4 * blk_bytes + (2 << 20), 16 << 20), 56 << 20))

    grid_spec = pltpu.PrefetchScalarGridSpec(
        num_scalar_prefetch=2,          # idx, inv_amp -> SMEM, visible to index_maps
        grid=(B,),
        in_specs=[
            # full mixture block for batch b, S packed into the sublane axis
            pl.BlockSpec((1, S * C, T), lambda b, idx_r, amp_r: (b, 0, 0)),
            # gathered background y[idx[b], 1] on the original 4-D layout
            pl.BlockSpec((1, 1, C, T), lambda b, idx_r, amp_r: (idx_r[b], 1, 0, 0)),
        ],
        out_specs=pl.BlockSpec((1, S * C, T), lambda b, idx_r, amp_r: (b, 0, 0)),
    )

    out = pl.pallas_call(
        mix_kernel,
        grid_spec=grid_spec,
        out_shape=jax.ShapeDtypeStruct((B, S * C, T), y.dtype),
        compiler_params=pltpu.CompilerParams(
            dimension_semantics=("parallel",),   # disjoint output per b; safe to shard (v7x 2 TCs)
            vmem_limit_bytes=vmem_limit,
        ),
        # NOTE: intentionally NO input_output_aliases — the gather reads y[idx[b], 1]
        # and aliasing would let an earlier/parallel step overwrite that slice.
    )(idx, inv_amp, y_r, y)

    return out.reshape(B, S, C, T)


if __name__ == "__main__":
    key = jax.random.PRNGKey(0)
    B, S, C, T = 4, 2, 4, 256            # S must be 2 (module broadcast requires it)
    min_db, max_db = 0.0, 5.0

    k_y, k_idx, k_db = jax.random.split(key, 3)
    y = jax.random.normal(k_y, (B, S, C, T), dtype=jnp.float32)
    indices_background = jax.random.randint(k_idx, (B,), 0, B)
    db_scales = jax.random.uniform(
        k_db, (B, 1, 1, 1), minval=min_db, maxval=max_db, dtype=jnp.float32)

    out = mix_forward(y, indices_background, db_scales, apply_mix=True)
    out = jax.block_until_ready(out)

    # pure-JAX reference (mirrors the PyTorch forward, training path)
    amp = 10.0 ** (db_scales / 20.0)                                    # (B,1,1,1)
    y_targets_only = jnp.repeat(y[indices_background, 1][:, None], S, axis=1)
    rms_bg = jnp.sqrt(jnp.mean(y_targets_only ** 2, axis=-1, keepdims=True))
    y_background = y_targets_only / (rms_bg + 1e-8)
    rms_background = jnp.sqrt(jnp.mean(y ** 2, axis=-1, keepdims=True)) / amp
    ref = y + y_background * rms_background

    assert out.shape == (B, S, C, T)
    assert jnp.allclose(out, ref, atol=1e-5, rtol=1e-5), "mismatch vs reference"
    print("KERNEL_OK")
</pallas_src>

<mosaic_0001>
module attributes {stable_mosaic.version = 11 : i64} {
  func.func @mix_kernel(%arg0: i32, %arg1: memref<4xi32, #tpu.memory_space<smem>>, %arg2: memref<4xf32, #tpu.memory_space<smem>>, %arg3: memref<1x8x256xf32, #tpu.memory_space<vmem>>, %arg4: memref<1x1x4x256xf32, #tpu.memory_space<vmem>>, %arg5: memref<1x8x256xf32, #tpu.memory_space<vmem>>) attributes {dimension_semantics = [#tpu.dimension_semantics<parallel>], iteration_bounds = array<i64: 4>, scalar_prefetch = 2 : i64, scratch_operands = 0 : i64, tpu.core_type = #tpu.core_type<tc>, window_params = [{transform_indices = @transform_0, window_bounds = array<i64: 1, 8, 256>}, {transform_indices = @transform_1, window_bounds = array<i64: 1, 1, 4, 256>}, {transform_indices = @transform_2, window_bounds = array<i64: 1, 8, 256>}]} {
    %0 = arith.index_cast %arg0 : i32 to index
    %1 = memref.load %arg2[%0] : memref<4xf32, #tpu.memory_space<smem>>
    %c0 = arith.constant 0 : index
    %c0_0 = arith.constant 0 : index
    %c0_1 = arith.constant 0 : index
    %2 = vector.load %arg3[%c0, %c0_0, %c0_1] : memref<1x8x256xf32, #tpu.memory_space<vmem>>, vector<1x8x256xf32>
    %3 = vector.shape_cast %2 : vector<1x8x256xf32> to vector<8x256xf32>
    %c0_2 = arith.constant 0 : index
    %c0_3 = arith.constant 0 : index
    %c0_4 = arith.constant 0 : index
    %c0_5 = arith.constant 0 : index
    %4 = vector.load %arg4[%c0_2, %c0_3, %c0_4, %c0_5] : memref<1x1x4x256xf32, #tpu.memory_space<vmem>>, vector<1x1x4x256xf32>
    %5 = vector.shape_cast %4 : vector<1x1x4x256xf32> to vector<4x256xf32>
    %6 = arith.mulf %5, %5 : vector<4x256xf32>
    %cst = arith.constant dense<0.000000e+00> : vector<4xf32>
    %7 = vector.multi_reduction <add>, %6, %cst [1] : vector<4x256xf32> to vector<4xf32>
    %8 = vector.shape_cast %7 : vector<4xf32> to vector<4x1xf32>
    %cst_6 = arith.constant 2.560000e+02 : f32
    %9 = vector.broadcast %cst_6 : f32 to vector<4x1xf32>
    %10 = arith.divf %8, %9 : vector<4x1xf32>
    %11 = math.sqrt %10 : vector<4x1xf32>
    %cst_7 = arith.constant 9.99999993E-9 : f32
    %12 = vector.broadcast %cst_7 : f32 to vector<4x1xf32>
    %13 = arith.addf %11, %12 : vector<4x1xf32>
    %cst_8 = arith.constant 1.000000e+00 : f32
    %14 = vector.broadcast %cst_8 : f32 to vector<4x1xf32>
    %15 = arith.divf %14, %13 : vector<4x1xf32>
    %16 = arith.mulf %3, %3 : vector<8x256xf32>
    %cst_9 = arith.constant dense<0.000000e+00> : vector<8xf32>
    %17 = vector.multi_reduction <add>, %16, %cst_9 [1] : vector<8x256xf32> to vector<8xf32>
    %18 = vector.shape_cast %17 : vector<8xf32> to vector<8x1xf32>
    %cst_10 = arith.constant 2.560000e+02 : f32
    %19 = vector.broadcast %cst_10 : f32 to vector<8x1xf32>
    %20 = arith.divf %18, %19 : vector<8x1xf32>
    %21 = math.sqrt %20 : vector<8x1xf32>
    %22 = tpu.concatenate %15, %15 in 0 : vector<4x1xf32>, vector<4x1xf32> -> vector<8x1xf32>
    %23 = vector.broadcast %1 : f32 to vector<8x1xf32>
    %24 = arith.mulf %21, %23 : vector<8x1xf32>
    %25 = arith.mulf %24, %22 : vector<8x1xf32>
    %26 = tpu.concatenate %5, %5 in 0 : vector<4x256xf32>, vector<4x256xf32> -> vector<8x256xf32>
    %27 = vector.broadcast %25 : vector<8x1xf32> to vector<8x256xf32>
    %28 = arith.mulf %26, %27 : vector<8x256xf32>
    %29 = arith.addf %3, %28 : vector<8x256xf32>
    %c0_11 = arith.constant 0 : index
    %c0_12 = arith.constant 0 : index
    %c0_13 = arith.constant 0 : index
    %30 = vector.load %arg5[%c0_11, %c0_12, %c0_13] : memref<1x8x256xf32, #tpu.memory_space<vmem>>, vector<1x8x256xf32>
    %31 = vector.shape_cast %30 : vector<1x8x256xf32> to vector<8x256xf32>
    %32 = vector.shape_cast %29 : vector<8x256xf32> to vector<1x8x256xf32>
    tpu.vector_store %arg5[%c0_11, %c0_12, %c0_13], %32 {strides = array<i32>} : memref<1x8x256xf32, #tpu.memory_space<vmem>>, vector<1x8x256xf32>,
    return
  }
  func.func @transform_0(%arg0: i32, %arg1: memref<4xi32, #tpu.memory_space<smem>>, %arg2: memref<4xf32, #tpu.memory_space<smem>>) -> (i32, i32, i32) {
    %c0_i32 = arith.constant 0 : i32
    %c0_i32_0 = arith.constant 0 : i32
    %c0_i32_1 = arith.constant 0 : i32
    return %arg0, %c0_i32, %c0_i32_0 : i32, i32, i32
  }
  func.func @transform_1(%arg0: i32, %arg1: memref<4xi32, #tpu.memory_space<smem>>, %arg2: memref<4xf32, #tpu.memory_space<smem>>) -> (i32, i32, i32, i32) {
    %0 = arith.index_cast %arg0 : i32 to index
    %1 = memref.load %arg1[%0] : memref<4xi32, #tpu.memory_space<smem>>
    %c1_i32 = arith.constant 1 : i32
    %c0_i32 = arith.constant 0 : i32
    %c0_i32_0 = arith.constant 0 : i32
    %c0_i32_1 = arith.constant 0 : i32
    return %1, %c1_i32, %c0_i32, %c0_i32_0 : i32, i32, i32, i32
  }
  func.func @transform_2(%arg0: i32, %arg1: memref<4xi32, #tpu.memory_space<smem>>, %arg2: memref<4xf32, #tpu.memory_space<smem>>) -> (i32, i32, i32) {
    %c0_i32 = arith.constant 0 : i32
    %c0_i32_0 = arith.constant 0 : i32
    %c0_i32_1 = arith.constant 0 : i32
    return %arg0, %c0_i32, %c0_i32_0 : i32, i32, i32
  }
}

</mosaic_0001>

<bundles_post_ra>
// kernel: tpu_custom_call.1
= control target key start
LH: loop header
LB: loop body
LE: loop exit
PB: predicated region body
PF: predicated region fallthrough
CT: control target
= control target key end

     0   :  { %s1001_s0 = inlined_call_operand.hbm [shape: s32[4], index: 0, kind: input, shape index: {}]   ;;  %s1002_s2 = inlined_call_operand.hbm [shape: f32[4,8,256], index: 2, kind: input, shape index: {}]   ;;  %s1003_s3 = inlined_call_operand.hbm [shape: f32[4,2,4,256], index: 3, kind: input, shape index: {}]   ;;  %s1004_s4 = inlined_call_operand.hbm [shape: f32[4,8,256], index: 4, kind: output, shape index: {}]   ;;  %s1005_s1 = inlined_call_operand.vmem [shape: f32[4], index: 1, kind: input, shape index: {}]  }
   0x1   :  { %1012 = sst [smem:[#allocation18_spill]] %s1002_s2  ;;  %s500_s17 = scalar_lea.hbm %s1001_s0, 16 }
   0x2   :  { %p501_p0 = scmp.ne.s32.totalorder %s1001_s0, %s500_s17  ;;  %p504_p1 = scmp.lt.u32.totalorder %s500_s17, %s1001_s0 }
   0x4   :  { %p506_p2 = pnand %p504_p1, %p501_p0 }
   0x6   :  { %509 = shalt.err (!%p506_p2)  }
   0x7   :  { %s681_s22 = smov [#allocation3]   ;;  %s11_s27 = sshll.u32 %s1005_s1, 4  ;;  %s12_s27 = int_to_ptr.vmem [resolvable:$true] %s11_s27 }
   0x8   :  { %10 = dma.hbm_to_smem %s1001_s0, 16, %s681_s22, [#allocation2] }
   0x9   :  { %s510_s28 = scalar_lea.vmem %s12_s27, 16  ;;  %p515_p4 = scmp.lt.s32.totalorder %s12_s27, %s12_s27 }
   0xa   :  { %p511_p3 = scmp.ne.s32.totalorder %s12_s27, %s510_s28  ;;  %p516_p5 = scmp.lt.s32.totalorder %s510_s28, %s510_s28 }
   0xc   :  { %p517_p6 = por %p516_p5, %p515_p4 }
   0xe   :  { %p518_p7 = pnand %p517_p6, %p511_p3 }
  0x10   :  { %521 = shalt.err (!%p518_p7)  }
  0x11   :  { %s682_s29 = smov [#allocation4]  }
  0x12   :  { %14 = dma.vmem_to_smem %s12_s27, 16, %s682_s29, [#allocation2] }
  0x13   :  { %639 = dma.done.wait [#allocation2], 32 }
  0x14   :  { %640 = vsyncadd [#allocation2], 4294967264 }
  0x15   :  { %16 = sfence }
  0x16   :  { %17 = vsyncpa [#allocation6], 0 }
  0x17   :  { %19 = vsyncpa [#allocation6 + $0x1], 0 }
  0x18   :  { %20 = vsyncpa [#allocation9], 0 }
  0x19   :  { %22 = vsyncpa [#allocation9 + $0x1], 0 }
  0x1a   :  { %23 = vsyncpa [#allocation7], 0 }
  0x1b   :  { %25 = vsyncpa [#allocation7 + $0x1], 0  ;;  %s727_s0 = smov 0   ;;  %s729_s1 = smov 0  }
  0x1c   :  { %s731_s30 = smov 0   ;;  %s733_s5 = smov 0  }
  0x1d   :  { %s735_s6 = smov 0   ;;  %s737_s7 = smov 0  }
  0x1e   :  { %s739_s8 = smov 0  }
  0x1f LB: > { %s763_s9 = sadd.s32 4294967295, %s679_s8   ;;  %s387_s10 = sadd.s32 4294967294, %s679_s8   ;;  %s679_s8 = sphi %s739_s8, %s1042_s8   ;;  %s675_s7 = sphi %s737_s7, %s1041_s7   ;;  %s671_s6 = sphi %s735_s6, %s1040_s6   ;;  %s667_s5 = sphi %s733_s5, %s1039_s5   ;;  %s663_s30 = sphi %s731_s30, %s1038_s30   ;;  %s659_s1 = sphi %s729_s1, %s1037_s1   ;;  %s655_s0 = sphi %s727_s0, %s1036_s0  }
  0x20   : > { %s767_s11 = sadd.s32 1, %s679_s8   ;;  %s38_s12 = sadd.s32 1, %s675_s7 }
  0x21   : > { %s35_s13 = ssub.s32 %s679_s8, %s767_s11  ;;  %p45_p8 = scmp.ne.s32.totalorder %s675_s7, %s671_s6 }
  0x22   : > { %p36_p9 = scmp.eq.s32.totalorder %s35_s13, 0  ;;  %p1007_p10 = scmp.eq.s32.totalorder %s679_s8, 0 }
  0x23   : > { %p51_p11 = scmp.ne.s32.totalorder %s671_s6, %s667_s5  ;;  %p1008_p12 = scmp.eq.s32.totalorder %s763_s9, 0 }
  0x24   : > { %s779_s14 = scalar_select %p36_p9, %s675_s7, %s38_s12  }
  0x25   : > { %p783_p13 = por %p1007_p10, %p45_p8  ;;  %p789_p0 = por %p1008_p12, %p51_p11 }
  0x26   : > { %1013 = sst [smem:[#allocation17_spill]] %s779_s14  ;;  %p103_p1 = scmp.eq.s32.totalorder %s763_s9, 3 }
  0x27   : > { %s1015_s16 = scalar_select %p789_p0, 1, 0 }
  0x28   : > { %s794_s17 = sld [smem:[#allocation3 + %s767_s11]]  ;;  %p109_p2 = scmp.eq.s32.totalorder %s387_s10, 3 }
  0x29   : > { %p797_p3 = por %p103_p1, %p45_p8  ;;  %p1006_p4 = scmp.lt.s32.totalorder %s679_s8, 4 }
  0x2a   : > { %p802_p5 = por %p109_p2, %p51_p11  ;;  %s129_s20 = sand.u32 1, %s675_s7  }
  0x2b   : > { %s1016_s18 = scalar_select %p797_p3, 1, 0 }
  0x2c   : > { %s1017_s19 = scalar_select %p802_p5, 1, 0 }
  0x2d   : > { %s390_s21 = sshll.u32 %s129_s20, 4  ;;  %s405_s22 = sshll.u32 %s679_s8, 8 }
  0x2e   : > { %s1018_s2 = sld [smem:[#allocation18_spill]]  ;;  %s133_s26 = scalar_lea.vmem [#allocation5], %s390_s21 }
  0x2f   : > { %s141_s27 = sshll.u32 %s133_s26, 4  ;;  %p819_p6 = pnand %p1006_p4, %p783_p13  ;;  %s813_s27 = int_to_ptr.vmem [resolvable:$true] %s141_s27 }
  0x30   : > { %s130_s29 = scalar_lea.sflag [#allocation6], %s129_s20 }
  0x31   : > { %p524_p11 = pneg %p819_p6 }
  0x34   : > { %s811_s25 = scalar_lea.hbm %s1018_s2, %s405_s22  ;;  %s527_s15 = scalar_lea.hbm %s1018_s2, 1024 }
  0x35   : > { %s522_s10 = scalar_lea.hbm %s811_s25, 256  ;;  %p528_p13 = scmp.lt.u32.totalorder %s811_s25, %s1018_s2 }
  0x36   : > { %p523_p9 = scmp.ne.s32.totalorder %s811_s25, %s522_s10  ;;  %p529_p4 = scmp.lt.u32.totalorder %s527_s15, %s522_s10 }
  0x37   : > { %p531_p12 = scmp.lt.u32.totalorder %s522_s10, %s811_s25 }
  0x38   : > { %p525_p1 = pnand %p524_p11, %p523_p9  ;;  %p530_p10 = por %p529_p4, %p528_p13 }
  0x3a   : > { %p526_p2 = pneg %p525_p1  ;;  %p532_p7 = por %p531_p12, %p530_p10 }
  0x3c   : > { %p533_p8 = pnand %p532_p7, %p526_p2 }
  0x3e   : > { %536 = shalt.err (!%p533_p8)
}
  0x3f   : > { %s537_s20 = scalar_lea.vmem %s813_s27, 256  ;;  %s683_s23 = smov [#allocation5]  }
  0x40   : > { %p538_p9 = scmp.ne.s32.totalorder %s813_s27, %s537_s20  ;;  %s542_s24 = sshll.u32 %s683_s23, 4  ;;  %s543_s24 = int_to_ptr.vmem [resolvable:$false] %s542_s24 }
  0x41   : > { %s544_s26 = scalar_lea.vmem %s543_s24, 512  ;;  %p545_p3 = scmp.lt.s32.totalorder %s813_s27, %s543_s24 }
  0x42   : > { %p540_p1 = pnand %p538_p9, %p524_p11  ;;  %p546_p4 = scmp.lt.s32.totalorder %s544_s26, %s537_s20 }
  0x44   : > { %p541_p5 = pneg %p540_p1  ;;  %p547_p13 = por %p546_p4, %p545_p3 }
  0x46   : > { %p548_p10 = pnand %p547_p13, %p541_p5 }
  0x48   : > { %551 = shalt.err (!%p548_p10)
}
  0x49   : > { %419 = dma.hbm_to_vmem [thread:$0]  (!%p819_p6), %s811_s25, 256, %s813_s27, %s130_s29  }
  0x4a   : > { %p1020_p12 = scmp.lt.s32.totalorder %s679_s8, 5  ;;  %p1021_p3 = scmp.ge.s32.totalorder %s679_s8, 1 }
  0x4b   : > { %s61_s10 = sld [smem:[#allocation3 + %s679_s8]]  ;;  %p73_p7 = scmp.ne.s32.totalorder %s663_s30, %s659_s1 }
  0x4c   : > { %p854_p5 = pnand %p1021_p3, %p1020_p12  ;;  %p79_p8 = scmp.ne.s32.totalorder %s659_s1, %s655_s0 }
  0x4d   : > { %p1023_p11 = scmp.eq.s32.totalorder %s763_s9, 0  ;;  %s148_s13 = sand.u32 1, %s663_s30  }
  0x4e   : > { %p1025_p9 = scmp.eq.s32.totalorder %s679_s8, 0  ;;  %s66_s25 = sadd.s32 1, %s663_s30 }
  0x4f   : > { %p865_p2 = por %p79_p8, %p1023_p11  ;;  %s393_s29 = sshll.u32 %s148_s13, 3 }
  0x50   : > { %p75_p1 = por %p73_p7, %p1025_p9  ;;  %p1026_p4 = scmp.lt.s32.totalorder %s679_s8, 4 }
  0x51   : > { %s1024_s12 = scalar_select %p865_p2, 1, 0 }
  0x52   : > { %s63_s27 = ssub.s32 %s61_s10, %s794_s17  ;;  %p876_p13 = pnand %p1026_p4, %p75_p1 }
  0x53   : > { %p64_p6 = scmp.eq.s32.totalorder %s63_s27, 0  ;;  %p1028_p10 = pmov %p1026_p4 }
  0x54   : > { %s409_s21 = scalar_select %p75_p1, [#allocation3], [#allocation11] }
  0x55   : > { %s881_s0 = scalar_select %p64_p6, %s663_s30, %s66_s25  }
  0x56   : > { %s410_s22 = scalar_select %p75_p1, %s679_s8, 0 }
  0x57   : > { %s1044_s21 = smov (!%p1028_p10, %s409_s21), [#allocation12]  ;;  %p1029_p12 = pmov %p1026_p4 }
  0x58   : > { %s152_s23 = scalar_lea.vmem [#allocation8], %s393_s29  ;;  %s149_s25 = scalar_lea.sflag [#allocation9], %s148_s13 }
  0x59   : > { %s1046_s22 = smov (!%p1029_p12, %s410_s22), 0  ;;  %s162_s17 = sshll.u32 %s152_s23, 4  ;;  %s888_s17 = int_to_ptr.vmem [resolvable:$true] %s162_s17 }
  0x5a   : > { %s153_s20 = sld [smem:[%s1044_s21 + %s1046_s22]]  ;;  %p554_p7 = pneg %p876_p13 }
  0x5b   : > { %s557_s22 = scalar_lea.hbm %s1003_s3, 1024 }
  0x60   : > { %s406_s24 = sshll.u32 %s153_s20, 8 }
  0x61   : > { %s329_s27 = scalar_lea.hbm %s1003_s3, %s406_s24 }
  0x62   : > { %s893_s2 = scalar_lea.hbm %s329_s27, 128  ;;  %s582_s14 = scalar_lea.hbm %s329_s27, 256 }
  0x63   : > { %p553_p3 = scmp.ne.s32.totalorder %s893_s2, %s582_s14  ;;  %p558_p9 = scmp.lt.u32.totalorder %s893_s2, %s1003_s3 }
  0x64   : > { %p559_p1 = scmp.lt.u32.totalorder %s557_s22, %s582_s14  ;;  %p561_p4 = scmp.lt.u32.totalorder %s582_s14, %s893_s2 }
  0x65   : > { %p555_p8 = pnand %p554_p7, %p553_p3 }
  0x66   : > { %p560_p6 = por %p559_p1, %p558_p9 }
  0x67   : > { %p556_p11 = pneg %p555_p8 }
  0x68   : > { %p562_p10 = por %p561_p4, %p560_p6 }
  0x6a   : > { %p563_p12 = pnand %p562_p10, %p556_p11 }
  0x6c   : > { %566 = shalt.err (!%p563_p12)
}
  0x6d   : > { %s567_s13 = scalar_lea.vmem %s888_s17, 128  ;;  %s684_s24 = smov [#allocation8]  }
  0x6e   : > { %p568_p3 = scmp.ne.s32.totalorder %s888_s17, %s567_s13  ;;  %s572_s26 = sshll.u32 %s684_s24, 4  ;;  %s573_s26 = int_to_ptr.vmem [resolvable:$false] %s572_s26 }
  0x6f   : > { %s574_s10 = scalar_lea.vmem %s573_s26, 256  ;;  %p575_p0 = scmp.lt.s32.totalorder %s888_s17, %s573_s26 }
  0x70   : > { %p570_p8 = pnand %p568_p3, %p554_p7  ;;  %p576_p9 = scmp.lt.s32.totalorder %s574_s10, %s567_s13 }
  0x72   : > { %p571_p2 = pneg %p570_p8  ;;  %p577_p1 = por %p576_p9, %p575_p0 }
  0x74   : > { %p578_p6 = pnand %p577_p1, %p571_p2 }
  0x76   : > { %581 = shalt.err (!%p578_p6)
}
  0x77   : > { %424 = dma.hbm_to_vmem [thread:$0]  (!%p876_p13), %s893_s2, 128, %s888_s17, %s149_s25  }
  0x78   : > { %171 = sbr.rel (%p854_p5) target bundleno = 463 (0x1cf), region = 28  ;;  %s922_s14 = sand.u32 (!%p854_p5), 1, %s671_s6  }
  0x79   : > { %s397_s27 = sshll.u32 (!%p854_p5), %s922_s14, 4  ;;  %s174_s29 = scalar_lea.sflag (!%p854_p5), [#allocation6], %s922_s14 }
  0x7a   : > { %s177_s21 = scalar_lea.vmem (!%p854_p5), [#allocation5], %s397_s27  ;;  %p1030_p0 = scmp.ne.s32.totalorder (!%p854_p5), %s1015_s16, 0 }
  0x7f   : > { %642 = dma.done.wait (%p1030_p0), %s174_s29, 256  }
  0x80   : > { %644 = vsyncadd (%p1030_p0), %s174_s29, 4294967040  ;;  %s182_s2 = sand.u32 1, %s659_s1   ;;  %p1031_p5 = scmp.ne.s32.totalorder %s1024_s12, 0 }
  0x81   : > { %s398_s28 = sshll.u32 %s182_s2, 3  ;;  %s183_s15 = scalar_lea.sflag [#allocation9], %s182_s2 }
  0x82   : > { %s186_s17 = scalar_lea.vmem [#allocation8], %s398_s28 }
  0x83   : > { %646 = dma.done.wait (%p1031_p5), %s183_s15, 128  }
  0x84   : > { %648 = vsyncadd (%p1031_p5), %s183_s15, 4294967168  ;;  %v216_v0 = vld [vmem:[%s186_s17] sm:$0xff]  ;;  %vm221_vm0 = vcmask 1043456   ;;  %v215_v3 = vld [vmem:[%s177_s21 + $0x8] sm:$0xff]  ;;  %v685_v11 = vmov 0   ;;  %s213_s16 = sld [smem:[#allocation4 + %s763_s9]] }
  0x85   : > { %v217_v1 = vmul.f32 %v216_v0, %v216_v0  ;;  %v214_v2 = vld [vmem:[%s177_s21] sm:$0xff]  ;;  %v240_v7 = vmul.f32 %v215_v3, %v215_v3  ;;  %490 = vset.pattern.permute.xlu1 %v685_v11  ;;  %491 = vset.pattern.permute.xlu0 %v685_v11  ;;  %v260_v33 = vcombine.high %v216_v0, %v216_v0  ;;  %s407_s12 = sshll.u32 %s763_s9, 8  ;;  %s211_s25 = scalar_lea.vmem [#allocation10], %s397_s27 }
  0x86   : > { %v239_v6 = vmul.f32 %v214_v2, %v214_v2  ;;  %v262_v34 = vcombine.low %v216_v0, %v216_v0  ;;  %s292_s22 = sshll.u32 %s211_s25, 4  ;;  %s949_s13 = scalar_lea.hbm %s1004_s4, %s407_s12  ;;  %s951_s22 = int_to_ptr.vmem [resolvable:$true] %s292_s22 }
  0x87   : > { %v219_v4 = vcombine.high %v217_v1, %v217_v1  ;;  %v222_v5 = vsel %vm221_vm0, %v217_v1, 0.0  ;;  %v265_v36 = vsel %vm221_vm0, %v260_v33, %v216_v0  ;;  %s278_s9 = scalar_lea.sflag [#allocation7], %s922_s14  ;;  %s583_s24 = scalar_lea.vmem %s951_s22, 256 }
  0x88   : > { %v241_v10 = vadd.f32 %v240_v7, %v239_v6  ;;  %v264_v35 = vsel %vm221_vm0, %v216_v0, %v262_v34  ;;  %p584_p2 = scmp.ne.s32.totalorder %s951_s22, %s583_s24  ;;  %p1032_p13 = scmp.ne.s32.totalorder %s1016_s18, 0 }
  0x89   : > { %v223_v8 = vsel %vm221_vm0, %v219_v4, 0.0  ;;  %s686_s26 = smov [#allocation10]  }
  0x8a   : > { %v224_v9 = vadd.f32 %v223_v8, %v222_v5  ;;  %v256_v27 = vstv %s213_s16  ;;  %p585_p7 = pnand %p584_p2, %p1032_p13  ;;  %s587_s10 = sshll.u32 %s686_s26, 4  ;;  %s588_s10 = int_to_ptr.vmem [resolvable:$false] %s587_s10 }
  0x8b   : > { %s589_s27 = scalar_lea.vmem %s588_s10, 512  ;;  %p590_p4 = scmp.lt.s32.totalorder %s951_s22, %s588_s10 }
  0x8c   : > { %225 = vadd.xlane.f32.xlu0 %v224_v9  ;;  %p586_p11 = pneg %p585_p7  ;;  %p591_p10 = scmp.lt.s32.totalorder %s589_s27, %s583_s24 }
  0x8e   : > { %p592_p12 = por %p591_p10, %p590_p4 }
  0x90   : > { %242 = vadd.xlane.f32.xlu0 %v241_v10  ;;  %p593_p3 = pnand %p592_p12, %p586_p11 }
 0x119   : > { %v226_v12 = vpop.xlane.xlu0 %225 }
 0x11a   : > { %v228_v13 = vmul.f32 0.00390625, %v226_v12 }
 0x11c   : > { %494 = vrsqrt.f32 %v228_v13  ;;  %vm231_vm1 = vcmp.eq.f32.partialorder %v228_v13, inf  ;;  %v234_v18 = vand.u32 2147483648, %v228_v13  ;;  %vm233_vm2 = vcmp.eq.f32.partialorder %v228_v13, 0.0 }
 0x11d   : > { %v243_v14 = vpop.xlane.xlu0 %242 }
 0x11e   : > { %v244_v15 = vmul.f32 0.00390625, %v243_v14 }
 0x120   : > { %496 = vrsqrt.f32 %v244_v15  ;;  %vm247_vm3 = vcmp.eq.f32.partialorder %v244_v15, inf  ;;  %v250_v25 = vand.u32 2147483648, %v244_v15  ;;  %vm249_vm4 = vcmp.eq.f32.partialorder %v244_v15, 0.0 }
 0x126   : > { %v495_v16 = vpop.eup %494 }
 0x127   : > { %v230_v17 = vmul.f32 %v495_v16, %v228_v13 }
 0x129   : > { %v232_v19 = vsel %vm231_vm1, %v228_v13, %v230_v17 }
 0x12a   : > { %v235_v20 = vsel %vm233_vm2, %v234_v18, %v232_v19  ;;  %v497_v22 = vpop.eup %496 }
 0x12b   : > { %v236_v21 = vadd.f32 1e-08, %v235_v20  ;;  %v246_v23 = vmul.f32 %v497_v22, %v244_v15 }
 0x12d   : > { %498 = vrcp.f32 %v236_v21  ;;  %v248_v24 = vsel %vm247_vm3, %v244_v15, %v246_v23 }
 0x12e   : > { %v251_v26 = vsel %vm249_vm4, %v250_v25, %v248_v24 }
 0x12f   : > { %v257_v30 = vmul.f32 %v256_v27, %v251_v26 }
 0x137   : > { %v499_v28 = vpop.eup %498 }
 0x138   : > { %v253_v29 = vrot.slane %v499_v28, 4 }
 0x13a   : > { %v255_v31 = vsel %vm221_vm0, %v499_v28, %v253_v29 }
 0x13b   : > { %v258_v32 = vmul.f32 %v257_v30, %v255_v31 }
 0x13d   : > { %268 = vperm.xlu1 %490, %v258_v32  }
 0x1bc   : > { %v269_v37 = vpop.permute.xlu1 %268 }
 0x1bd   : > { %v271_v38 = vmul.f32 %v269_v37, %v264_v35  ;;  %v272_v39 = vmul.f32 %v269_v37, %v265_v36 }
 0x1bf   : > { %v273_v40 = vadd.f32 %v271_v38, %v214_v2  ;;  %v274_v41 = vadd.f32 %v272_v39, %v215_v3 }
 0x1c1   : > { %275 = vst [vmem:[%s211_s25] sm:$0xff] %v273_v40  ;;  %276 = vst [vmem:[%s211_s25 + $0x8] sm:$0xff] %v274_v41 }
 0x1c2   : > { %596 = shalt.err (!%p593_p3)
}
 0x1c3   : > { %s597_s14 = scalar_lea.hbm %s949_s13, 256  ;;  %s601_s2 = scalar_lea.hbm %s1004_s4, 1024 }
 0x1c4   : > { %p598_p8 = scmp.ne.s32.totalorder %s949_s13, %s597_s14  ;;  %p602_p6 = scmp.lt.u32.totalorder %s949_s13, %s1004_s4 }
 0x1c5   : > { %p603_p0 = scmp.lt.u32.totalorder %s601_s2, %s597_s14  ;;  %p605_p2 = scmp.lt.u32.totalorder %s597_s14, %s949_s13 }
 0x1c6   : > { %p599_p9 = pnand %p598_p8, %p1032_p13 }
 0x1c7   : > { %p604_p5 = por %p603_p0, %p602_p6 }
 0x1c8   : > { %p600_p1 = pneg %p599_p9 }
 0x1c9   : > { %p606_p7 = por %p605_p2, %p604_p5 }
 0x1cb   : > { %p607_p11 = pnand %p606_p7, %p600_p1 }
 0x1cd   : > { %610 = shalt.err (!%p607_p11)
}
 0x1ce   : > { %414 = dma.vmem_to_hbm [thread:$0]  (%p1032_p13), %s951_s22, 256, %s949_s13, %s278_s9  }
 0x1cf PF: > { %p430_p4 = scmp.ge.s32.totalorder %s679_s8, 2  ;;  %s304_s17 = sand.u32 1, %s667_s5  }
 0x1d0   : > { %p1033_p10 = scmp.ne.s32.totalorder %s1017_s19, 0  ;;  %s305_s16 = scalar_lea.sflag [#allocation7], %s304_s17 }
 0x1d2   : > { %p426_p12 = pnand %p430_p4, %p1033_p10 }
 0x1d4   : > { %650 = dma.done.wait (!%p426_p12), %s305_s16, 256  }
 0x1d5   : > { %652 = vsyncadd (!%p426_p12), %s305_s16, 4294967040  ;;  %s1034_s12 = smov %s881_s0  ;;  %s1035_s18 = sld [smem:[#allocation17_spill]] }
 0x1d6   : > { %p28_p13 = scmp.ge.s32.totalorder %s767_s11, 6   ;;  %s1036_s0 = smov %s659_s1 }
 0x1d7   : > { %s1037_s1 = smov %s663_s30  ;;  %s1038_s30 = smov %s1034_s12 }
 0x1d8   : > { %s1039_s5 = smov %s671_s6  ;;  %s1040_s6 = smov %s675_s7 }
 0x1d9   : > { %s1042_s8 = smov %s767_s11  ;;  %30 = sbr.rel (!%p28_p13) target bundleno = 31 (0x1f), region = 86 }
 0x1db   : > { %s1041_s7 = smov %s1035_s18 }
 0x1e0   :  { %310 = vsyncpa [#allocation6], 1 }
 0x1e1   :  { %312 = vsyncpa [#allocation6 + $0x1], 1 }
 0x1e2   :  { %313 = vsyncpa [#allocation9], 1 }
 0x1e3   :  { %315 = vsyncpa [#allocation9 + $0x1], 1 }
 0x1e4   :  { %316 = vsyncpa [#allocation7], 1 }
 0x1e5   :  { %318 = vsyncpa [#allocation7 + $0x1], 1 }

</bundles_post_ra>
